<compile_context>
chip_gen: v5e
topology: v5e:2x2
jax: 0.10.0
libtpu: 0.0.40
codegen_flags: <defaults>
</compile_context>

<pallas_src>
from functools import partial

import jax
import jax.numpy as jnp
from jax.experimental import pallas as pl
from jax.experimental.pallas import tpu as pltpu

_LANE = 128
_MAX_TQ = 4096            # lanes per grid step when tiling (VMEM footprint per
                          # step ~ 2(dbl-buf) * 14 * TQ * B * 4 B  -> well under limits)
_MIN_SPLIT_BYTES = 2 << 20  # only tile when >= ~1 MiB of work per TensorCore


def _round_up(x, m):
    return ((x + m - 1) // m) * m


def _choose_tiling(B, Q, itemsize):
    """Pick (TQ, grid_q). Single whole-Q block unless there's enough work to
    split across v7x's two TensorCores (parallel grid >= 2 steps)."""
    # bytes per query: lines 4 in + 4 out, cls0 1 in, scores 1 out
    total_bytes = B * Q * 10 * itemsize
    if Q <= _LANE or total_bytes < _MIN_SPLIT_BYTES:
        return Q, 1
    tq = min(_round_up(pl.cdiv(Q, 2), _LANE), _MAX_TQ)
    return tq, pl.cdiv(Q, tq)


def _postprocess_kernel(cls0_ref, lines_ref, scale_ref, scores_ref, out_lines_ref):
    # scores: logistic -> EUP exp path; f32 internal math, cast only on store.
    scores_ref[...] = jax.nn.sigmoid(
        cls0_ref[...].astype(jnp.float32)).astype(scores_ref.dtype)
    # lines: flattened [B, 4*TQ] block in native memory order times the
    # lane-dense periodic [h,w,h,w,...] scale tile -> plain full-vreg VPU mul,
    # fully lane-dense (4*TQ is a multiple of 128 or the whole array) stores.
    out_lines_ref[...] = (lines_ref[...].astype(jnp.float32)
                          * scale_ref[...]).astype(out_lines_ref.dtype)


def _postprocess_pallas(cls0, lines_flat, scale4, tile_q=None):
    """cls0: [B, Q] class-0 logits; lines_flat: [B, 4*Q] (native order);
    scale4: [B, 4] = [h, w, h, w] per image (f32)."""
    B, Q = cls0.shape

    if tile_q is None:
        TQ, grid_q = _choose_tiling(B, Q, lines_flat.dtype.itemsize)
    else:
        TQ, grid_q = tile_q, pl.cdiv(Q, tile_q)

    # Lane-periodic scale tile covering one lines block; constant index_map so
    # it is fetched once and reused for every grid step.
    scale_tile = jnp.tile(scale4, (1, TQ))  # [B, 4*TQ]

    scores, lines_scaled = pl.pallas_call(
        _postprocess_kernel,
        out_shape=(
            jax.ShapeDtypeStruct((B, Q), cls0.dtype),
            jax.ShapeDtypeStruct((B, 4 * Q), lines_flat.dtype),
        ),
        grid=(grid_q,),
        in_specs=[
            pl.BlockSpec((B, TQ), lambda q: (0, q)),          # class-0 logits
            pl.BlockSpec((B, 4 * TQ), lambda q: (0, q)),      # flattened lines
            pl.BlockSpec((B, 4 * TQ), lambda q: (0, 0)),      # periodic scale (constant)
        ],
        out_specs=(
            pl.BlockSpec((B, TQ), lambda q: (0, q)),
            pl.BlockSpec((B, 4 * TQ), lambda q: (0, q)),
        ),
        compiler_params=pltpu.CompilerParams(
            dimension_semantics=("parallel",)),
    )(cls0, lines_flat, scale_tile)

    return scores, lines_scaled


@partial(jax.jit, static_argnames=("tile_q",))
def _postprocess_arrays(pred_logits, pred_lines, target_sizes, tile_q=None):
    """Returns stacked (scores [B,Q], lines [B,Q,4]). Only the cheap class-0
    slice and the tiny scale-tile build live in the XLA wrapper; the dominant
    lines tensor goes through the kernel in its native memory order (free
    reshapes in/out, no transposes, no pad, no post-slice)."""
    B, Q, _C = pred_logits.shape
    cls0 = pred_logits[..., 0]                                   # [B, Q]
    lines_flat = pred_lines.reshape(B, Q * 4)                    # free view
    # torch: target_sizes.repeat(1, 2) -> [h, w, h, w] per image.
    scale4 = jnp.tile(target_sizes, (1, 2)).astype(jnp.float32)  # [B, 4]

    scores, lines_flat_scaled = _postprocess_pallas(cls0, lines_flat, scale4,
                                                    tile_q=tile_q)
    return scores, lines_flat_scaled.reshape(B, Q, 4)            # free view


def postprocess(pred_logits, pred_lines, target_sizes, deploy_mode=False,
                tile_q=None):
    scores, lines = _postprocess_arrays(pred_logits, pred_lines, target_sizes,
                                        tile_q=tile_q)
    if deploy_mode:
        return lines, scores
    # Non-deploy (coco-api) mode: per-image dict views built outside jit from
    # the already-stacked device arrays (matches the torch module's API).
    B = int(scores.shape[0])
    return [{"lines": lines[b], "scores": scores[b]} for b in range(B)]


if __name__ == "__main__":
    key = jax.random.PRNGKey(0)
    k1, k2, k3 = jax.random.split(key, 3)

    # Small shapes consistent with the module: batch=2, queries=8, classes=4.
    B, Q, C = 2, 8, 4
    pred_logits = jax.random.normal(k1, (B, Q, C), dtype=jnp.float32)
    pred_lines = jax.random.uniform(k2, (B, Q, 4), dtype=jnp.float32)
    target_sizes = jax.random.uniform(
        k3, (B, 2), dtype=jnp.float32, minval=100.0, maxval=800.0)

    # deploy mode: stacked arrays straight from the kernel (single-block path).
    lines, scores = postprocess(pred_logits, pred_lines, target_sizes,
                                deploy_mode=True)
    jax.block_until_ready(lines)
    jax.block_until_ready(scores)

    # Reference check in plain JAX.
    ref_scores = jax.nn.sigmoid(pred_logits[..., 0])
    ref_lines = pred_lines * jnp.tile(target_sizes, (1, 2))[:, None, :]
    assert jnp.allclose(scores, ref_scores, atol=1e-6)
    assert jnp.allclose(lines, ref_lines, atol=1e-3, rtol=1e-5)

    # non-deploy mode: list of per-image dicts (torch-style API).
    results = postprocess(pred_logits, pred_lines, target_sizes)
    assert jnp.allclose(results[0]["scores"], ref_scores[0], atol=1e-6)
    assert jnp.allclose(results[1]["lines"], ref_lines[1], atol=1e-3, rtol=1e-5)

    # Exercise the multi-step grid + masked partial boundary block (Q=300 not a
    # multiple of 128, forced 128-lane tiles -> grid of 3 with masked last block).
    Q2 = 300
    k4, k5 = jax.random.split(k2)
    logits2 = jax.random.normal(k4, (B, Q2, C), dtype=jnp.float32)
    lines_in2 = jax.random.uniform(k5, (B, Q2, 4), dtype=jnp.float32)
    lines2, scores2 = postprocess(logits2, lines_in2, target_sizes,
                                  deploy_mode=True, tile_q=128)
    jax.block_until_ready(lines2)
    ref_scores2 = jax.nn.sigmoid(logits2[..., 0])
    ref_lines2 = lines_in2 * jnp.tile(target_sizes, (1, 2))[:, None, :]
    assert jnp.allclose(scores2, ref_scores2, atol=1e-6)
    assert jnp.allclose(lines2, ref_lines2, atol=1e-3, rtol=1e-5)

    print("KERNEL_OK")
</pallas_src>

<mosaic_0001>
module attributes {stable_mosaic.version = 11 : i64} {
  func.func @_postprocess_kernel(%arg0: i32, %arg1: memref<2x8xf32, #tpu.memory_space<vmem>>, %arg2: memref<2x32xf32, #tpu.memory_space<vmem>>, %arg3: memref<2x32xf32, #tpu.memory_space<vmem>>, %arg4: memref<2x8xf32, #tpu.memory_space<vmem>>, %arg5: memref<2x32xf32, #tpu.memory_space<vmem>>) attributes {dimension_semantics = [#tpu.dimension_semantics<parallel>], iteration_bounds = array<i64: 1>, scalar_prefetch = 0 : i64, scratch_operands = 0 : i64, tpu.core_type = #tpu.core_type<tc>, window_params = [{transform_indices = @transform_0, window_bounds = array<i64: 2, 8>}, {transform_indices = @transform_1, window_bounds = array<i64: 2, 32>}, {pipeline_mode = #tpu.pipeline_mode<synchronous>, transform_indices = @transform_2, window_bounds = array<i64: 2, 32>}, {transform_indices = @transform_3, window_bounds = array<i64: 2, 8>}, {transform_indices = @transform_4, window_bounds = array<i64: 2, 32>}]} {
    %c0 = arith.constant 0 : index
    %c0_0 = arith.constant 0 : index
    %0 = vector.load %arg1[%c0, %c0_0] : memref<2x8xf32, #tpu.memory_space<vmem>>, vector<2x8xf32>
    %1 = arith.negf %0 : vector<2x8xf32>
    %2 = math.exp %1 : vector<2x8xf32>
    %cst = arith.constant 1.000000e+00 : f32
    %3 = vector.broadcast %cst : f32 to vector<2x8xf32>
    %4 = arith.addf %3, %2 : vector<2x8xf32>
    %5 = arith.divf %3, %4 : vector<2x8xf32>
    %c0_1 = arith.constant 0 : index
    %c0_2 = arith.constant 0 : index
    %6 = vector.load %arg4[%c0_1, %c0_2] : memref<2x8xf32, #tpu.memory_space<vmem>>, vector<2x8xf32>
    tpu.vector_store %arg4[%c0_1, %c0_2], %5 {strides = array<i32>} : memref<2x8xf32, #tpu.memory_space<vmem>>, vector<2x8xf32>,
    %c0_3 = arith.constant 0 : index
    %c0_4 = arith.constant 0 : index
    %7 = vector.load %arg2[%c0_3, %c0_4] : memref<2x32xf32, #tpu.memory_space<vmem>>, vector<2x32xf32>
    %c0_5 = arith.constant 0 : index
    %c0_6 = arith.constant 0 : index
    %8 = vector.load %arg3[%c0_5, %c0_6] : memref<2x32xf32, #tpu.memory_space<vmem>>, vector<2x32xf32>
    %9 = arith.mulf %7, %8 : vector<2x32xf32>
    %c0_7 = arith.constant 0 : index
    %c0_8 = arith.constant 0 : index
    %10 = vector.load %arg5[%c0_7, %c0_8] : memref<2x32xf32, #tpu.memory_space<vmem>>, vector<2x32xf32>
    tpu.vector_store %arg5[%c0_7, %c0_8], %9 {strides = array<i32>} : memref<2x32xf32, #tpu.memory_space<vmem>>, vector<2x32xf32>,
    return
  }
  func.func @transform_0(%arg0: i32) -> (i32, i32) {
    %c0_i32 = arith.constant 0 : i32
    %c0_i32_0 = arith.constant 0 : i32
    return %c0_i32, %arg0 : i32, i32
  }
  func.func @transform_1(%arg0: i32) -> (i32, i32) {
    %c0_i32 = arith.constant 0 : i32
    %c0_i32_0 = arith.constant 0 : i32
    return %c0_i32, %arg0 : i32, i32
  }
  func.func @transform_2(%arg0: i32) -> (i32, i32) {
    %c0_i32 = arith.constant 0 : i32
    %c0_i32_0 = arith.constant 0 : i32
    %c0_i32_1 = arith.constant 0 : i32
    return %c0_i32, %c0_i32_0 : i32, i32
  }
  func.func @transform_3(%arg0: i32) -> (i32, i32) {
    %c0_i32 = arith.constant 0 : i32
    %c0_i32_0 = arith.constant 0 : i32
    return %c0_i32, %arg0 : i32, i32
  }
  func.func @transform_4(%arg0: i32) -> (i32, i32) {
    %c0_i32 = arith.constant 0 : i32
    %c0_i32_0 = arith.constant 0 : i32
    return %c0_i32, %arg0 : i32, i32
  }
}

</mosaic_0001>

<bundles_post_ra>
// kernel: tile.17
= control target key start
LH: loop header
LB: loop body
LE: loop exit
PB: predicated region body
PF: predicated region fallthrough
CT: control target
= control target key end

     0   :  { %s7_s6 = smov 3  ;;  %s21_s9 = smov 3  ;;  %vm4_vm0 = vcmask 31744   ;;  %vm11_vm1 = vcmask 261344   ;;  %vm18_vm2 = vcmask 228544   ;;  %vm25_vm3 = vcmask 195744   ;;  %s119_s0 = inlined_call_operand.vmem [shape: f32[2,8,4], index: 0, kind: input, shape index: {}]   ;;  %s120_s1 = inlined_call_operand.vmem [shape: f32[2,32], index: 1, kind: output, shape index: {}]  }
   0x1   :  { %v61_v0 = vld [vmem:[%s119_s0 + $0x7] ss:$8 sm:%s7_s6]   ;;  %s75_s10 = smov 28   ;;  %v63_v1 = vld [vmem:[%s119_s0 + $0x5] ss:$8 sm:%s21_s9]   ;;  %s76_s13 = smov 20  }
   0x2   :  { %9 = vrot.lane.b32.xlu0 %v61_v0, %s75_s10  ;;  %23 = vrot.lane.b32.xlu1 %v63_v1, %s76_s13  ;;  %s14_s14 = smov 3  ;;  %s28_s15 = smov 3  ;;  %vm32_vm4 = vcmask 162944   ;;  %vm39_vm5 = vcmask 130144   ;;  %vm46_vm6 = vcmask 97344   ;;  %vm53_vm7 = vcmask 64544  }
   0x3   :  { %s35_s16 = smov 3  ;;  %v62_v3 = vld [vmem:[%s119_s0 + $0x6] ss:$8 sm:%s14_s14]   ;;  %s77_s21 = smov 12   ;;  %v64_v4 = vld [vmem:[%s119_s0 + $0x4] ss:$8 sm:%s28_s15]  }
   0x4   :  { %v65_v2 = vld [vmem:[%s119_s0 + $0x3] ss:$8 sm:%s35_s16]   ;;  %s42_s24 = smov 3  ;;  %s78_s25 = smov 24  }
   0x5   :  { %37 = vrot.lane.b32.xlu2 %v65_v2, %s77_s21  ;;  %s79_s26 = smov 16   ;;  %s49_s27 = smov 3  ;;  %v66_v5 = vld [vmem:[%s119_s0 + $0x2] ss:$8 sm:%s42_s24]  }
   0x6   :  { %v67_v6 = vld [vmem:[%s119_s0 + $0x1] ss:$8 sm:%s49_s27]   ;;  %s80_s3 = smov 8   ;;  %s81_s4 = smov 4  }
   0x7   :  { %s2_s5 = smov 3 }
   0x8   :  { %v3_v7 = vld [vmem:[%s119_s0] ss:$8 sm:%s2_s5]  }
   0x9   :  { %5 = vst.msk [vmem:[#allocation0] sm:$0x3] %vm4_vm0, %v3_v7  }
   0xa   :  { %16 = vrot.lane.b32.xlu0 %v62_v3, %s78_s25  ;;  %30 = vrot.lane.b32.xlu1 %v64_v4, %s79_s26 }
   0xd   :  { %44 = vrot.lane.b32.xlu2 %v66_v5, %s80_s3 }
  0x12   :  { %51 = vrot.lane.b32.xlu0 %v67_v6, %s81_s4 }
  0x5f   :  { %v38_v8 = vpop.permute.xlu2 %37  }
  0x67   :  { %v45_v9 = vpop.permute.xlu2 %44  }
  0x74   :  { %v10_v10 = vpop.permute.xlu0 %9   ;;  %v24_v11 = vpop.permute.xlu1 %23  }
  0x75   :  { %12 = vst.msk [vmem:[#allocation0] sm:$0x3] %vm11_vm1, %v10_v10  }
  0x7c   :  { %v17_v12 = vpop.permute.xlu0 %16   ;;  %v31_v13 = vpop.permute.xlu1 %30  }
  0x7d   :  { %19 = vst.msk [vmem:[#allocation0] sm:$0x3] %vm18_vm2, %v17_v12  }
  0x7e   :  { %26 = vst.msk [vmem:[#allocation0] sm:$0x3] %vm25_vm3, %v24_v11  }
  0x7f   :  { %33 = vst.msk [vmem:[#allocation0] sm:$0x3] %vm32_vm4, %v31_v13  }
  0x80   :  { %40 = vst.msk [vmem:[#allocation0] sm:$0x3] %vm39_vm5, %v38_v8  }
  0x81   :  { %47 = vst.msk [vmem:[#allocation0] sm:$0x3] %vm46_vm6, %v45_v9  }
  0x84   :  { %v52_v14 = vpop.permute.xlu0 %51  }
  0x85   :  { %54 = vst.msk [vmem:[#allocation0] sm:$0x3] %vm53_vm7, %v52_v14  }
  0x8c   :  { %v57_v15 = vld [vmem:[#allocation0] sm:$0x3] }
  0x8d   :  { %60 = vst [vmem:[%s120_s1] sm:$0x3] %v57_v15 }

// kernel: _postprocess_arrays.1
= control target key start
LH: loop header
LB: loop body
LE: loop exit
PB: predicated region body
PF: predicated region fallthrough
CT: control target
= control target key end

     0   :  { %vm42_vm0 = vcmask 254976   ;;  %s137_s0 = inlined_call_operand.vmem [shape: f32[2,8], index: 0, kind: input, shape index: {}]   ;;  %s138_s1 = inlined_call_operand.vmem [shape: f32[2,32], index: 1, kind: input, shape index: {}]   ;;  %s139_s2 = inlined_call_operand.vmem [shape: f32[2,32], index: 2, kind: input, shape index: {}]   ;;  %s140_s3 = inlined_call_operand.hbm [shape: f32[2,8], index: 3, kind: output, shape index: {0}]   ;;  %s141_s4 = inlined_call_operand.vmem [shape: f32[2,32], index: 4, kind: output, shape index: {1}]  }
   0x1   :  { %v17_v0 = vld [vmem:[%s137_s0] sm:$0x3] }
   0x2   :  { %v39_v1 = vld [vmem:[%s138_s1] sm:$0x3]  ;;  %v64_v2 = vmul.f32 -1.442695, %v17_v0 }
   0x3   :  { %v40_v3 = vld [vmem:[%s139_s2] sm:$0x3] }
   0x4   :  { %10 = vsyncpa [#allocation3], 0  ;;  %v41_v4 = vmul.f32 %v40_v3, %v39_v1  ;;  %66 = vpow2.f32 %v64_v2  ;;  %s96_s0 = smov [#allocation2]   ;;  %s51_s24 = sshll.u32 %s140_s3, 4  ;;  %vm37_vm5 = vcmask 58368   ;;  %s52_s24 = int_to_ptr.hbm [resolvable:$true] %s51_s24 }
   0x5   :  { %s49_s1 = sshll.u32 %s96_s0, 4  ;;  %s50_s1 = int_to_ptr.vmem [resolvable:$true] %s49_s1 }
   0x6   :  { %43 = vst.msk [vmem:[%s141_s4] sm:$0x3] %vm42_vm0, %v41_v4 }
   0xa   :  { %v67_v5 = vpop.eup %66 }
   0xb   :  { %v21_v6 = vadd.f32 1.0, %v67_v5 }
   0xd   :  { %68 = vrcp.f32 %v21_v6  ;;  %v33_v9 = vand.u32 2147483648, %v21_v6  ;;  %vm27_vm1 = vweird.f32 %v21_v6  ;;  %v31_v11 = vand.u32 2147483647, %v21_v6 }
   0xf   :  { %v34_v13 = vor.u32 1.1754944e-38, %v33_v9  ;;  %vm32_vm4 = vcmp.eq.f32.partialorder %v31_v11, 8.507059e+37 }
  0x13   :  { %v69_v7 = vpop.eup %68 }
  0x14   :  { %v23_v8 = vmul.f32 %v69_v7, %v21_v6  ;;  %vm28_vm2 = vweird.f32 %v69_v7 }
  0x15   :  { %vm29_vm3 = vmor %vm27_vm1, %vm28_vm2 }
  0x16   :  { %v24_v10 = vsub.f32 1.0, %v23_v8 }
  0x18   :  { %v25_v12 = vmul.f32 %v69_v7, %v24_v10 }
  0x1a   :  { %v26_v14 = vadd.f32 %v69_v7, %v25_v12 }
  0x1c   :  { %v30_v15 = vsel %vm29_vm3, %v69_v7, %v26_v14 }
  0x1d   :  { %v35_v16 = vsel %vm32_vm4, %v34_v13, %v30_v15 }
  0x1e   :  { %38 = vst.msk [vmem:[#allocation2] sm:$0x3] %vm37_vm5, %v35_v16 }
  0x1f   :  { %54 = dma.vmem_to_hbm [thread:$0]  %s50_s1, 32, %s52_s24, [#allocation3]  }
  0x20   :  { %94 = dma.done.wait [#allocation3], 32  }
  0x21   :  { %95 = vsyncadd [#allocation3], 4294967264 }
  0x22   :  { %63 = vsyncpa [#allocation3], 1 }

</bundles_post_ra>
